<compile_context>
chip_gen: v6e
topology: v6e:2x2x1
jax: 0.10.0
libtpu: 0.0.40
codegen_flags: <defaults>
</compile_context>

<pallas_src>
from functools import partial

import jax
import jax.numpy as jnp
from jax.experimental import pallas as pl
from jax.experimental.pallas import tpu as pltpu

LANES = 128
SUBLANES = 8
NCORES = 2  # leading parallel grid axis (v7x megacore); harmless on v5e/v6e


def _ceil_div(a, b):
    return -(-a // b)


def _round_up(a, b):
    return _ceil_div(a, b) * b


def myloss_kernel(x_ref, y_ref, w_ref, o_ref, acc_ref, *,
                  epsilon, n_rows, bm, steps_per_core):
    j = pl.program_id(1)

    @pl.when(j == 0)
    def _():
        acc_ref[...] = jnp.zeros_like(acc_ref)

    # Global (unclamped) row-block index of this step -- only used for masking.
    g = pl.program_id(0) * steps_per_core + j
    row0 = g * bm

    # Cast to f32 *inside* the kernel (inputs stream in their native dtype).
    x = x_ref[...].astype(jnp.float32)
    y = y_ref[...].astype(jnp.float32)
    w = w_ref[...].astype(jnp.float32)

    # entropy = -y*log(x+eps) - (1-y)*log(1-x+eps)   (log -> EUP, mul/add -> VPU)
    ent = -y * jnp.log(x + epsilon) - (1.0 - y) * jnp.log(1.0 - x + epsilon)

    # Mask the ragged row tail (and any phantom clamped block) in-kernel.
    # jnp.where selects, so NaN/Inf garbage in masked rows does not propagate.
    row_ids = jax.lax.broadcasted_iota(jnp.int32, (x.shape[0], 1), 0) + row0
    ew = jnp.where(row_ids < n_rows, ent * w, 0.0)

    # Tiny accumulator: per-step sublane reduce into a (1, C) f32 slab.
    acc_ref[...] += jnp.sum(ew, axis=0, keepdims=True)

    @pl.when(j == pl.num_programs(1) - 1)
    def _():
        o_ref[...] = acc_ref[...].reshape(o_ref.shape)


def myloss(input_, label, weight, *, epsilon=1e-8, block_rows=1024):
    """Pallas equivalent of Myloss.forward: sum(weighted BCE) / 2."""
    x = jnp.asarray(input_)
    y = jnp.asarray(label)
    w = jnp.asarray(weight)

    shape = jnp.broadcast_shapes(x.shape, y.shape, w.shape)
    # TODO(synk): stream genuinely-lower-rank label/weight as small constant-index
    # VMEM/SMEM blocks instead of materializing broadcast copies (only hit when
    # the caller passes non-full-shape operands).
    if x.shape != shape:
        x = jnp.broadcast_to(x, shape)
    if y.shape != shape:
        y = jnp.broadcast_to(y, shape)
    if w.shape != shape:
        w = jnp.broadcast_to(w, shape)

    # Collapse to 2-D (rows, cols); collapsing contiguous leading dims is free.
    if len(shape) == 0:
        R, C = 1, 1
    elif len(shape) == 1:
        R, C = 1, int(shape[0])
    else:
        C = int(shape[-1])
        R = 1
        for d in shape[:-1]:
            R *= int(d)
    x2 = x.reshape(R, C)
    y2 = y.reshape(R, C)
    w2 = w.reshape(R, C)

    # Row-block size: big enough to amortize per-grid-step overhead, small
    # enough that 3 inputs x 2 pipeline buffers fit the default scoped VMEM on
    # every generation (incl. v5e's 16 MiB), and split across NCORES cores.
    c_pad = _round_up(max(C, 1), LANES)
    dma_bytes_per_row = 2 * (x2.dtype.itemsize + y2.dtype.itemsize
                             + w2.dtype.itemsize) * c_pad
    vmem_budget = 12 * 1024 * 1024
    bm = min(2048, int(block_rows),
             max(SUBLANES, vmem_budget // max(dma_bytes_per_row, 1)))
    bm = min(bm, _round_up(_ceil_div(R, NCORES), SUBLANES))
    bm = max(SUBLANES, (bm // SUBLANES) * SUBLANES)
    if bm >= R:
        bm = R  # full-extent block: always a legal block shape

    nb = _ceil_div(R, bm)           # number of real row blocks
    spc = _ceil_div(nb, NCORES)     # reduction steps per core

    if spc * NCORES == nb:
        in_idx = lambda i, j: (i * spc + j, 0)
    else:
        # Clamp phantom trailing blocks to the last real block; the in-kernel
        # row mask zeroes their contribution, so nothing is double-counted.
        in_idx = lambda i, j: (jnp.minimum(i * spc + j, nb - 1), 0)

    in_spec = pl.BlockSpec((bm, C), in_idx)

    partials = pl.pallas_call(
        partial(myloss_kernel, epsilon=float(epsilon), n_rows=R, bm=bm,
                steps_per_core=spc),
        out_shape=jax.ShapeDtypeStruct((NCORES, 1, C), jnp.float32),
        grid_spec=pltpu.PrefetchScalarGridSpec(
            num_scalar_prefetch=0,
            grid=(NCORES, spc),
            in_specs=[in_spec, in_spec, in_spec],
            out_specs=pl.BlockSpec((1, 1, C), lambda i, j: (i, 0, 0)),
            scratch_shapes=[pltpu.VMEM((1, C), jnp.float32)],
        ),
        compiler_params=pltpu.CompilerParams(
            dimension_semantics=("parallel", "arbitrary"),
        ),
    )(x2, y2, w2)

    # Tiny final fold (2*C f32 values) + the /2 from the reference module.
    return jnp.sum(partials) * 0.5


def myloss_ref(input_, label, weight, epsilon=1e-8):
    ent = (-label * jnp.log(input_ + epsilon)
           - (1.0 - label) * jnp.log(1.0 - input_ + epsilon))
    return jnp.sum(ent * weight) / 2.0


if __name__ == "__main__":
    key = jax.random.PRNGKey(0)
    k1, k2, k3, k4, k5, k6 = jax.random.split(key, 6)

    # Shapes consistent with the module's elementwise usage:
    # batch=2, channels=4, spatial=16x16 probability maps.
    shape = (2, 4, 16, 16)
    input_ = jax.nn.sigmoid(jax.random.normal(k1, shape, jnp.float32))
    label = (jax.random.uniform(k2, shape) > 0.5).astype(jnp.float32)
    weight = jax.random.uniform(k3, shape, jnp.float32)

    out = jax.block_until_ready(myloss(input_, label, weight))
    ref = myloss_ref(input_, label, weight)
    assert jnp.abs(out - ref) <= 1e-4 * jnp.maximum(1.0, jnp.abs(ref)), (out, ref)

    # Small ragged bf16 case: exercises in-kernel tail masking, the clamped
    # phantom block and the in-kernel dtype cast (no wrapper pad / upcast).
    shape2 = (50, 45)
    input2 = jax.nn.sigmoid(jax.random.normal(k4, shape2, jnp.float32)).astype(jnp.bfloat16)
    label2 = (jax.random.uniform(k5, shape2) > 0.5).astype(jnp.bfloat16)
    weight2 = jax.random.uniform(k6, shape2, jnp.float32).astype(jnp.bfloat16)

    out2 = jax.block_until_ready(myloss(input2, label2, weight2))
    ref2 = myloss_ref(input2.astype(jnp.float32), label2.astype(jnp.float32),
                      weight2.astype(jnp.float32))
    assert jnp.abs(out2 - ref2) <= 1e-3 * jnp.maximum(1.0, jnp.abs(ref2)), (out2, ref2)

    print("KERNEL_OK")
</pallas_src>

<mosaic_0001>
module attributes {stable_mosaic.version = 11 : i64} {
  func.func @myloss_kernel(%arg0: i32, %arg1: i32, %arg2: memref<64x16xf32, #tpu.memory_space<vmem>>, %arg3: memref<64x16xf32, #tpu.memory_space<vmem>>, %arg4: memref<64x16xf32, #tpu.memory_space<vmem>>, %arg5: memref<1x1x16xf32, #tpu.memory_space<vmem>>, %arg6: memref<1x16xf32, #tpu.memory_space<vmem>>) attributes {dimension_semantics = [#tpu.dimension_semantics<parallel>, #tpu.dimension_semantics<arbitrary>], iteration_bounds = array<i64: 2, 1>, scalar_prefetch = 0 : i64, scratch_operands = 1 : i64, tpu.core_type = #tpu.core_type<tc>, window_params = [{transform_indices = @transform_0, window_bounds = array<i64: 64, 16>}, {transform_indices = @transform_1, window_bounds = array<i64: 64, 16>}, {transform_indices = @transform_2, window_bounds = array<i64: 64, 16>}, {transform_indices = @transform_3, window_bounds = array<i64: 1, 1, 16>}]} {
    %c0_i32 = arith.constant 0 : i32
    %0 = arith.cmpi eq, %arg1, %c0_i32 : i32
    %1 = arith.extui %0 : i1 to i32
    %c0_i32_0 = arith.constant 0 : i32
    %2 = arith.cmpi ne, %1, %c0_i32_0 : i32
    scf.if %2 {
      %cst_18 = arith.constant 0.000000e+00 : f32
      %42 = vector.broadcast %cst_18 : f32 to vector<1x16xf32>
      %c0_19 = arith.constant 0 : index
      %c0_20 = arith.constant 0 : index
      %43 = vector.load %arg6[%c0_19, %c0_20] : memref<1x16xf32, #tpu.memory_space<vmem>>, vector<1x16xf32>
      tpu.vector_store %arg6[%c0_19, %c0_20], %42 {strides = array<i32>} : memref<1x16xf32, #tpu.memory_space<vmem>>, vector<1x16xf32>,
    } else {
    }
    %c1_i32 = arith.constant 1 : i32
    %3 = arith.muli %arg0, %c1_i32 : i32
    %4 = arith.addi %3, %arg1 : i32
    %c64_i32 = arith.constant 64 : i32
    %5 = arith.muli %4, %c64_i32 : i32
    %c0 = arith.constant 0 : index
    %c0_1 = arith.constant 0 : index
    %6 = vector.load %arg2[%c0, %c0_1] : memref<64x16xf32, #tpu.memory_space<vmem>>, vector<64x16xf32>
    %c0_2 = arith.constant 0 : index
    %c0_3 = arith.constant 0 : index
    %7 = vector.load %arg3[%c0_2, %c0_3] : memref<64x16xf32, #tpu.memory_space<vmem>>, vector<64x16xf32>
    %c0_4 = arith.constant 0 : index
    %c0_5 = arith.constant 0 : index
    %8 = vector.load %arg4[%c0_4, %c0_5] : memref<64x16xf32, #tpu.memory_space<vmem>>, vector<64x16xf32>
    %cst = arith.constant 0.000000e+00 : f32
    %9 = vector.broadcast %cst : f32 to vector<64x16xf32>
    %10 = arith.subf %9, %7 : vector<64x16xf32>
    %cst_6 = arith.constant 9.99999993E-9 : f32
    %11 = vector.broadcast %cst_6 : f32 to vector<64x16xf32>
    %12 = arith.addf %6, %11 : vector<64x16xf32>
    %13 = math.log %12 : vector<64x16xf32>
    %14 = arith.mulf %10, %13 : vector<64x16xf32>
    %cst_7 = arith.constant 1.000000e+00 : f32
    %15 = vector.broadcast %cst_7 : f32 to vector<64x16xf32>
    %16 = arith.subf %15, %7 : vector<64x16xf32>
    %cst_8 = arith.constant 1.000000e+00 : f32
    %17 = vector.broadcast %cst_8 : f32 to vector<64x16xf32>
    %18 = arith.subf %17, %6 : vector<64x16xf32>
    %cst_9 = arith.constant 9.99999993E-9 : f32
    %19 = vector.broadcast %cst_9 : f32 to vector<64x16xf32>
    %20 = arith.addf %18, %19 : vector<64x16xf32>
    %21 = math.log %20 : vector<64x16xf32>
    %22 = arith.mulf %16, %21 : vector<64x16xf32>
    %23 = arith.subf %14, %22 : vector<64x16xf32>
    %24 = tpu.iota {dimensions = array<i32: 0>} : vector<64x1xi32>
    %25 = vector.broadcast %5 : i32 to vector<64x1xi32>
    %26 = arith.addi %24, %25 : vector<64x1xi32>
    %c128_i32 = arith.constant 128 : i32
    %27 = vector.broadcast %c128_i32 : i32 to vector<64x1xi32>
    %28 = arith.cmpi slt, %26, %27 : vector<64x1xi32>
    %29 = arith.mulf %23, %8 : vector<64x16xf32>
    %cst_10 = arith.constant 0.000000e+00 : f32
    %30 = vector.shape_cast %28 : vector<64x1xi1> to vector<64x1xi1>
    %31 = vector.broadcast %30 : vector<64x1xi1> to vector<64x16xi1>
    %32 = vector.broadcast %cst_10 : f32 to vector<64x16xf32>
    %33 = arith.select %31, %29, %32 : vector<64x16xi1>, vector<64x16xf32>
    %c0_11 = arith.constant 0 : index
    %c0_12 = arith.constant 0 : index
    %34 = vector.load %arg6[%c0_11, %c0_12] : memref<1x16xf32, #tpu.memory_space<vmem>>, vector<1x16xf32>
    %cst_13 = arith.constant dense<0.000000e+00> : vector<16xf32>
    %35 = vector.multi_reduction <add>, %33, %cst_13 [0] : vector<64x16xf32> to vector<16xf32>
    %36 = vector.shape_cast %35 : vector<16xf32> to vector<1x16xf32>
    %37 = arith.addf %34, %36 : vector<1x16xf32>
    %c0_14 = arith.constant 0 : index
    %c0_15 = arith.constant 0 : index
    %38 = vector.load %arg6[%c0_14, %c0_15] : memref<1x16xf32, #tpu.memory_space<vmem>>, vector<1x16xf32>
    tpu.vector_store %arg6[%c0_14, %c0_15], %37 {strides = array<i32>} : memref<1x16xf32, #tpu.memory_space<vmem>>, vector<1x16xf32>,
    %c0_i32_16 = arith.constant 0 : i32
    %39 = arith.cmpi eq, %arg1, %c0_i32_16 : i32
    %40 = arith.extui %39 : i1 to i32
    %c0_i32_17 = arith.constant 0 : i32
    %41 = arith.cmpi ne, %40, %c0_i32_17 : i32
    scf.if %41 {
      %c0_18 = arith.constant 0 : index
      %c0_19 = arith.constant 0 : index
      %42 = vector.load %arg6[%c0_18, %c0_19] : memref<1x16xf32, #tpu.memory_space<vmem>>, vector<1x16xf32>
      %43 = vector.shape_cast %42 : vector<1x16xf32> to vector<1x1x16xf32>
      %c0_20 = arith.constant 0 : index
      %c0_21 = arith.constant 0 : index
      %c0_22 = arith.constant 0 : index
      %44 = vector.load %arg5[%c0_20, %c0_21, %c0_22] : memref<1x1x16xf32, #tpu.memory_space<vmem>>, vector<1x1x16xf32>
      tpu.vector_store %arg5[%c0_20, %c0_21, %c0_22], %43 {strides = array<i32>} : memref<1x1x16xf32, #tpu.memory_space<vmem>>, vector<1x1x16xf32>,
    } else {
    }
    return
  }
  func.func @transform_0(%arg0: i32, %arg1: i32) -> (i32, i32) {
    %c1_i32 = arith.constant 1 : i32
    %0 = arith.muli %arg0, %c1_i32 : i32
    %1 = arith.addi %0, %arg1 : i32
    %c0_i32 = arith.constant 0 : i32
    %c0_i32_0 = arith.constant 0 : i32
    return %1, %c0_i32 : i32, i32
  }
  func.func @transform_1(%arg0: i32, %arg1: i32) -> (i32, i32) {
    %c1_i32 = arith.constant 1 : i32
    %0 = arith.muli %arg0, %c1_i32 : i32
    %1 = arith.addi %0, %arg1 : i32
    %c0_i32 = arith.constant 0 : i32
    %c0_i32_0 = arith.constant 0 : i32
    return %1, %c0_i32 : i32, i32
  }
  func.func @transform_2(%arg0: i32, %arg1: i32) -> (i32, i32) {
    %c1_i32 = arith.constant 1 : i32
    %0 = arith.muli %arg0, %c1_i32 : i32
    %1 = arith.addi %0, %arg1 : i32
    %c0_i32 = arith.constant 0 : i32
    %c0_i32_0 = arith.constant 0 : i32
    return %1, %c0_i32 : i32, i32
  }
  func.func @transform_3(%arg0: i32, %arg1: i32) -> (i32, i32, i32) {
    %c0_i32 = arith.constant 0 : i32
    %c0_i32_0 = arith.constant 0 : i32
    %c0_i32_1 = arith.constant 0 : i32
    return %arg0, %c0_i32, %c0_i32_0 : i32, i32, i32
  }
}

</mosaic_0001>

<bundles_post_ra>
// kernel: tpu_custom_call.1
= control target key start
LH: loop header
LB: loop body
LE: loop exit
PB: predicated region body
PF: predicated region fallthrough
CT: control target
= control target key end

     0   :  { %8 = vsyncpa [#allocation4], 0  ;;  %s972_s0 = inlined_call_operand.vmem [shape: f32[128,16], index: 0, kind: input, shape index: {}]   ;;  %s973_s1 = inlined_call_operand.vmem [shape: f32[128,16], index: 1, kind: input, shape index: {}]   ;;  %s974_s2 = inlined_call_operand.vmem [shape: f32[128,16], index: 2, kind: input, shape index: {}]   ;;  %s975_s3 = inlined_call_operand.hbm [shape: f32[2,1,16], index: 3, kind: output, shape index: {}]  }
   0x1   :  { %10 = vsyncpa [#allocation4 + $0x1], 0  ;;  %s767_s12 = smov 0   ;;  %s769_s13 = smov 0  }
   0x2   :  { %s771_s14 = smov 0   ;;  %s773_s15 = smov 0  }
   0x3   :  { %s775_s16 = smov 0   ;;  %s777_s17 = smov 0  }
   0x4 LB: > { %s564_s18 = sadd.s32 4294967295, %s743_s17   ;;  %s565_s19 = sadd.s32 4294967294, %s743_s17   ;;  %s743_s17 = sphi %s777_s17, %s16_s17   ;;  %s739_s16 = sphi %s775_s16, %s982_s16   ;;  %s735_s15 = sphi %s773_s15, %s981_s15   ;;  %s731_s14 = sphi %s771_s14, %s980_s14   ;;  %s727_s13 = sphi %s769_s13, %s979_s13   ;;  %s723_s12 = sphi %s767_s12, %s978_s12  }
   0x5   : > { %s28_s20 = sadd.s32 1, %s739_s16  ;;  %s119_s21 = sadd.s32 1, %s731_s14 }
   0x6   : > { %p30_p0 = scmp.ge.s32.totalorder %s28_s20, 2  ;;  %p129_p1 = scmp.ne.s32.totalorder %s731_s14, %s727_s13 }
   0x7   : > { %p130_p2 = scmp.eq.s32.totalorder %s564_s18, 1  ;;  %p135_p3 = scmp.ne.s32.totalorder %s727_s13, %s723_s12 }
   0x8   : > { %s984_s20 = smov (%p30_p0, %s28_s20), 0  ;;  %p136_p5 = scmp.eq.s32.totalorder %s565_s19, 1 }
   0x9   : > { %p807_p4 = por %p130_p2, %p129_p1  ;;  %s116_s23 = ssub.s32 %s739_s16, %s984_s20 }
   0xa   : > { %p568_p6 = scmp.ge.s32.totalorder %s743_s17, 1  ;;  %p117_p7 = scmp.eq.s32.totalorder %s116_s23, 0 }
   0xb   : > { %p814_p8 = por %p136_p5, %p135_p3  ;;  %p187_p9 = scmp.lt.s32.totalorder %s743_s17, 3 }
   0xc   : > { %s820_s25 = scalar_select %p117_p7, %s731_s14, %s119_s21  }
   0xd   : > { %p188_p10 = pnand %p568_p6, %p187_p9 }
   0xe   : > { %s569_s26 = sshll.u32 (!%p188_p10), %s735_s15, 3  ;;  %s575_s4 = sshll.u32 (!%p188_p10), %s735_s15, 6 }
   0xf   : > { %191 = sbr.rel (%p188_p10) target bundleno = 109 (0x6d), region = 32  ;;  %p225_p11 = scmp.lt.s32.totalorder (!%p188_p10), %s569_s26, 15 }
  0x10   : > { %s221_s11 = sand.u32 (!%p188_p10), 1, %s727_s13   ;;  %s576_s21 = sshll.u32 (!%p188_p10), %s735_s15, 4 }
  0x11   : > { %s222_s18 = scalar_lea.vmem (!%p188_p10), [#allocation3], %s221_s11  ;;  %s465_s28 = scalar_lea.sflag (!%p188_p10), [#allocation4], %s221_s11 }
  0x12   : > { %s477_s19 = sshll.u32 (!%p188_p10), %s222_s18, 4  ;;  %s928_s19 = int_to_ptr.vmem [resolvable:$true] %s477_s19 }
  0x13   : > { %s667_s29 = scalar_lea.vmem (!%p188_p10), %s928_s19, 16 }
  0x14   : > { %vm251_vm0 = vcmask 122880   ;;  %v745_v0 = vmov 0.0   ;;  %s986_s26 = smov (!%p225_p11, %s569_s26), 15  ;;  %v375_v12 = vlaneseq  ;;  %v384_v33 = vstv %s575_s4  ;;  %p668_p12 = scmp.ne.s32.totalorder %s928_s19, %s667_s29 }
  0x15   : > { %252 = vst.msk [vmem:[#allocation2] sm:$0x1] %vm251_vm0, %v745_v0  ;;  %s824_s27 = sshll.u32 %s986_s26, 3  ;;  %vm434_vm4 = vcmask 130048  }
  0x16   : > { %s228_s30 = scalar_lea.vmem %s972_s0, %s824_s27  ;;  %v376_v22 = vshrl.u32 %v375_v12, 7  ;;  %s236_s7 = scalar_lea.vmem %s973_s1, %s824_s27 }
  0x17   : > { %v255_v1 = vld [vmem:[%s228_s30] sm:$0xff]  ;;  %v256_v2 = vld [vmem:[%s228_s30 + $0x8] sm:$0xff]  ;;  %v257_v4 = vld [vmem:[%s228_s30 + $0x10] sm:$0xff]  ;;  %s890_s10 = scalar_lea.vmem %s974_s2, %s824_s27  ;;  %s475_s27 = scalar_lea.hbm %s975_s3, %s576_s21 }
  0x18   : > { %v287_v3 = vadd.f32 1e-08, %v255_v1  ;;  %v288_v5 = vadd.f32 1e-08, %v256_v2  ;;  %v258_v6 = vld [vmem:[%s228_s30 + $0x18] sm:$0xff]  ;;  %v259_v8 = vld [vmem:[%s228_s30 + $0x20] sm:$0xff]  ;;  %v845_v49 = vadd.s32 %v384_v33, %v376_v22  ;;  %p669_p13 = pnand %p668_p12, %p807_p4 }
  0x19   : > { %v289_v7 = vadd.f32 1e-08, %v257_v4  ;;  %v290_v9 = vadd.f32 1e-08, %v258_v6  ;;  %v260_v10 = vld [vmem:[%s228_s30 + $0x28] sm:$0xff]  ;;  %v261_v13 = vld [vmem:[%s228_s30 + $0x30] sm:$0xff] }
  0x1a   : > { %v291_v11 = vadd.f32 1e-08, %v259_v8  ;;  %635 = vlog2.f32 %v287_v3  ;;  %v292_v14 = vadd.f32 1e-08, %v260_v10  ;;  %v262_v15 = vld [vmem:[%s228_s30 + $0x38] sm:$0xff]  ;;  %v327_v17 = vsub.f32 1.0, %v255_v1  ;;  %p670_p0 = pneg %p669_p13 }
  0x1b   : > { %637 = vlog2.f32 %v288_v5  ;;  %v293_v16 = vadd.f32 1e-08, %v261_v13  ;;  %v328_v18 = vsub.f32 1.0, %v256_v2  ;;  %v294_v19 = vadd.f32 1e-08, %v262_v15  ;;  %v835_v43 = vld [vmem:[%s236_s7] sm:$0xff] }
  0x1c   : > { %639 = vlog2.f32 %v289_v7  ;;  %v329_v20 = vsub.f32 1.0, %v257_v4  ;;  %v330_v21 = vsub.f32 1.0, %v258_v6  ;;  %v331_v23 = vsub.f32 1.0, %v259_v8  ;;  %v837_v44 = vld [vmem:[%s236_s7 + $0x8] sm:$0xff]  ;;  %v839_v46 = vld [vmem:[%s236_s7 + $0x10] sm:$0xff]  ;;  %v841_v47 = vld [vmem:[%s236_s7 + $0x18] sm:$0xff] }
  0x1d   : > { %641 = vlog2.f32 %v290_v9  ;;  %v332_v24 = vsub.f32 1.0, %v260_v10  ;;  %v333_v25 = vsub.f32 1.0, %v261_v13  ;;  %v335_v26 = vadd.f32 1e-08, %v327_v17  ;;  %v843_v48 = vld [vmem:[%s236_s7 + $0x20] sm:$0xff]  ;;  %v849_v52 = vld [vmem:[%s236_s7 + $0x28] sm:$0xff] }
  0x1e   : > { %643 = vlog2.f32 %v291_v11  ;;  %v336_v27 = vadd.f32 1e-08, %v328_v18  ;;  %v334_v28 = vsub.f32 1.0, %v262_v15  ;;  %v337_v29 = vadd.f32 1e-08, %v329_v20  ;;  %v851_v53 = vld [vmem:[%s236_s7 + $0x30] sm:$0xff] }
  0x1f   : > { %645 = vlog2.f32 %v292_v14  ;;  %v338_v30 = vadd.f32 1e-08, %v330_v21  ;;  %v339_v31 = vadd.f32 1e-08, %v331_v23  ;;  %v377_v32 = vadd.s32 8, %v376_v22  ;;  %v853_v54 = vld [vmem:[%s236_s7 + $0x38] sm:$0xff] }
  0x20   : > { %647 = vlog2.f32 %v293_v16  ;;  %v340_v34 = vadd.f32 1e-08, %v332_v24  ;;  %v378_v35 = vadd.s32 16, %v376_v22  ;;  %v379_v36 = vadd.s32 24, %v376_v22  ;;  %s746_s30 = smov [#allocation3]  }
  0x21   : > { %649 = vlog2.f32 %v294_v19  ;;  %v341_v37 = vadd.f32 1e-08, %v333_v25  ;;  %v380_v38 = vadd.s32 32, %v376_v22  ;;  %v381_v39 = vadd.s32 40, %v376_v22  ;;  %s671_s15 = sshll.u32 %s746_s30, 4  ;;  %s672_s15 = int_to_ptr.vmem [resolvable:$false] %s671_s15 }
  0x22   : > { %651 = vlog2.f32 %v335_v26  ;;  %v342_v40 = vadd.f32 1e-08, %v334_v28  ;;  %v382_v41 = vadd.s32 48, %v376_v22  ;;  %v383_v42 = vadd.s32 56, %v376_v22  ;;  %s673_s4 = scalar_lea.vmem %s672_s15, 32  ;;  %p674_p1 = scmp.lt.s32.totalorder %s928_s19, %s672_s15 }
  0x23   : > { %653 = vlog2.f32 %v336_v27  ;;  %v847_v50 = vadd.s32 %v384_v33, %v377_v32  ;;  %v855_v55 = vadd.s32 %v384_v33, %v378_v35  ;;  %v857_v56 = vadd.s32 %v384_v33, %v379_v36  ;;  %p675_p2 = scmp.lt.s32.totalorder %s673_s4, %s667_s29 }
  0x24   : > { %655 = vlog2.f32 %v337_v29  ;;  %v859_v57 = vadd.s32 %v384_v33, %v380_v38  ;;  %v861_v59 = vadd.s32 %v384_v33, %v381_v39  ;;  %v863_v60 = vadd.s32 %v384_v33, %v382_v41 }
  0x25   : > { %657 = vlog2.f32 %v338_v30  ;;  %v865_v61 = vadd.s32 %v384_v33, %v383_v42  ;;  %v279_v63 = vsub.f32 0.0, %v835_v43  ;;  %v280_v0 = vsub.f32 0.0, %v837_v44  ;;  %p676_p3 = por %p675_p2, %p674_p1 }
  0x26   : > { %659 = vlog2.f32 %v339_v31  ;;  %v281_v1 = vsub.f32 0.0, %v839_v46  ;;  %v282_v2 = vsub.f32 0.0, %v841_v47  ;;  %v283_v4 = vsub.f32 0.0, %v843_v48 }
  0x27   : > { %v636_v45 = vpop.eup %635  ;;  %661 = vlog2.f32 %v340_v34  ;;  %v284_v5 = vsub.f32 0.0, %v849_v52  ;;  %v285_v6 = vsub.f32 0.0, %v851_v53  ;;  %v286_v7 = vsub.f32 0.0, %v853_v54  ;;  %p677_p5 = pnand %p676_p3, %p670_p0 }
  0x28   : > { %v638_v51 = vpop.eup %637  ;;  %663 = vlog2.f32 %v341_v37  ;;  %v296_v9 = vmul.f32 0.6931472, %v636_v45  ;;  %v319_v10 = vsub.f32 1.0, %v835_v43  ;;  %v320_v11 = vsub.f32 1.0, %v837_v44 }
  0x29   : > { %v640_v58 = vpop.eup %639  ;;  %665 = vlog2.f32 %v342_v40  ;;  %v321_v12 = vsub.f32 1.0, %v839_v46  ;;  %v298_v14 = vmul.f32 0.6931472, %v638_v51  ;;  %v322_v15 = vsub.f32 1.0, %v841_v47  ;;  %v271_v40 = vld [vmem:[%s890_s10] sm:$0xff]  ;;  %v272_v46 = vld [vmem:[%s890_s10 + $0x8] sm:$0xff] }
  0x2a   : > { %v642_v62 = vpop.eup %641  ;;  %v323_v16 = vsub.f32 1.0, %v843_v48  ;;  %v324_v17 = vsub.f32 1.0, %v849_v52  ;;  %vm393_vm1 = vcmp.lt.s32.totalorder %v845_v49, 128  ;;  %v300_v19 = vmul.f32 0.6931472, %v640_v58 }
  0x2b   : > { %v644_v3 = vpop.eup %643  ;;  %v302_v20 = vmul.f32 0.6931472, %v642_v62  ;;  %v325_v21 = vsub.f32 1.0, %v851_v53  ;;  %v326_v22 = vsub.f32 1.0, %v853_v54  ;;  %vm394_vm2 = vcmp.lt.s32.totalorder %v847_v50, 128  ;;  %v273_v54 = vld [vmem:[%s890_s10 + $0x10] sm:$0xff] }
  0x2c   : > { %v646_v8 = vpop.eup %645  ;;  %v304_v24 = vmul.f32 0.6931472, %v644_v3  ;;  %vm395_vm3 = vcmp.lt.s32.totalorder %v855_v55, 128  ;;  %v311_v28 = vmul.f32 %v296_v9, %v279_v63  ;;  %vm396_vm5 = vcmp.lt.s32.totalorder %v857_v56, 128  ;;  %v275_v9 = vld [vmem:[%s890_s10 + $0x20] sm:$0xff] }
  0x2d   : > { %v648_v13 = vpop.eup %647  ;;  %v306_v25 = vmul.f32 0.6931472, %v646_v8  ;;  %v312_v32 = vmul.f32 %v298_v14, %v280_v0  ;;  %vm397_vm6 = vcmp.lt.s32.totalorder %v859_v57, 128  ;;  %v313_v35 = vmul.f32 %v300_v19, %v281_v1  ;;  %v277_v19 = vld [vmem:[%s890_s10 + $0x30] sm:$0xff] }
  0x2e   : > { %v650_v18 = vpop.eup %649  ;;  %v308_v27 = vmul.f32 0.6931472, %v648_v13  ;;  %v314_v36 = vmul.f32 %v302_v20, %v282_v2  ;;  %v315_v41 = vmul.f32 %v304_v24, %v283_v4  ;;  %vm398_vm7 = vcmp.lt.s32.totalorder %v861_v59, 128  ;;  %v274_v2 = vld [vmem:[%s890_s10 + $0x18] sm:$0xff]  ;;  %v276_v13 = vld [vmem:[%s890_s10 + $0x28] sm:$0xff] }
  0x2f   : > { %v652_v23 = vpop.eup %651  ;;  %v310_v31 = vmul.f32 0.6931472, %v650_v18  ;;  %v316_v42 = vmul.f32 %v306_v25, %v284_v5  ;;  %vm399_vm8 = vcmp.lt.s32.totalorder %v863_v60, 128  ;;  %vm400_vm9 = vcmp.lt.s32.totalorder %v865_v61, 128 }
  0x30   : > { %v654_v26 = vpop.eup %653  ;;  %v344_v29 = vmul.f32 0.6931472, %v652_v23  ;;  %v317_v47 = vmul.f32 %v308_v27, %v285_v6 }
  0x31   : > { %v656_v30 = vpop.eup %655  ;;  %v346_v33 = vmul.f32 0.6931472, %v654_v26  ;;  %v318_v58 = vmul.f32 %v310_v31, %v286_v7 }
  0x32   : > { %v658_v34 = vpop.eup %657  ;;  %v348_v37 = vmul.f32 0.6931472, %v656_v30  ;;  %v359_v38 = vmul.f32 %v344_v29, %v319_v10 }
  0x33   : > { %v660_v39 = vpop.eup %659  ;;  %v350_v43 = vmul.f32 0.6931472, %v658_v34  ;;  %v360_v44 = vmul.f32 %v346_v33, %v320_v11 }
  0x34   : > { %v662_v45 = vpop.eup %661  ;;  %v352_v48 = vmul.f32 0.6931472, %v660_v39  ;;  %v361_v51 = vmul.f32 %v348_v37, %v321_v12  ;;  %v367_v52 = vsub.f32 %v311_v28, %v359_v38 }
  0x35   : > { %v664_v53 = vpop.eup %663  ;;  %v354_v62 = vmul.f32 0.6931472, %v662_v45  ;;  %v362_v63 = vmul.f32 %v350_v43, %v322_v15  ;;  %v368_v0 = vsub.f32 %v312_v32, %v360_v44 }
  0x36   : > { %v666_v1 = vpop.eup %665  ;;  %v356_v3 = vmul.f32 0.6931472, %v664_v53  ;;  %v363_v4 = vmul.f32 %v352_v48, %v323_v16  ;;  %v369_v5 = vsub.f32 %v313_v35, %v361_v51  ;;  %v401_v8 = vmul.f32 %v367_v52, %v271_v40 }
  0x37   : > { %v358_v6 = vmul.f32 0.6931472, %v666_v1  ;;  %v364_v10 = vmul.f32 %v354_v62, %v324_v17  ;;  %v370_v11 = vsub.f32 %v314_v36, %v362_v63  ;;  %v402_v12 = vmul.f32 %v368_v0, %v272_v46 }
  0x38   : > { %v365_v14 = vmul.f32 %v356_v3, %v325_v21  ;;  %v371_v18 = vsub.f32 %v315_v41, %v363_v4  ;;  %v403_v7 = vmul.f32 %v369_v5, %v273_v54  ;;  %v425_v15 = vsel %vm393_vm1, %v401_v8, 0.0  ;;  %v278_v21 = vld [vmem:[%s890_s10 + $0x38] sm:$0xff] }
  0x39   : > { %v366_v20 = vmul.f32 %v358_v6, %v326_v22  ;;  %v372_v23 = vsub.f32 %v316_v42, %v364_v10  ;;  %v404_v24 = vmul.f32 %v370_v11, %v274_v2  ;;  %v426_v16 = vsel %vm394_vm2, %v402_v12, 0.0 }
  0x3a   : > { %v373_v25 = vsub.f32 %v317_v47, %v365_v14  ;;  %v405_v26 = vmul.f32 %v371_v18, %v275_v9  ;;  %v427_v17 = vsel %vm395_vm3, %v403_v7, 0.0  ;;  %v435_v27 = vsel %vm434_vm4, %v425_v15, 0.0  ;;  %v433_v47 = vld [vmem:[#allocation2] sm:$0x1] }
  0x3b   : > { %v374_v28 = vsub.f32 %v318_v58, %v366_v20  ;;  %v406_v29 = vmul.f32 %v372_v23, %v276_v13  ;;  %v428_v49 = vsel %vm396_vm5, %v404_v24, 0.0  ;;  %v436_v22 = vsel %vm434_vm4, %v426_v16, 0.0 }
  0x3c   : > { %v407_v30 = vmul.f32 %v373_v25, %v277_v19  ;;  %v429_v50 = vsel %vm397_vm6, %v405_v26, 0.0  ;;  %v437_v31 = vadd.f32 %v436_v22, %v435_v27  ;;  %v438_v32 = vsel %vm434_vm4, %v427_v17, 0.0 }
  0x3d   : > { %v440_v55 = vsel %vm434_vm4, %v428_v49, 0.0  ;;  %v408_v33 = vmul.f32 %v374_v28, %v278_v21  ;;  %v430_v34 = vsel %vm398_vm7, %v406_v29, 0.0  ;;  %v442_v56 = vsel %vm434_vm4, %v429_v50, 0.0 }
  0x3e   : > { %v439_v35 = vadd.f32 %v438_v32, %v437_v31  ;;  %v431_v36 = vsel %vm399_vm8, %v407_v30, 0.0  ;;  %v444_v57 = vsel %vm434_vm4, %v430_v34, 0.0 }
  0x3f   : > { %v432_v38 = vsel %vm400_vm9, %v408_v33, 0.0  ;;  %v446_v60 = vsel %vm434_vm4, %v431_v36, 0.0 }
  0x40   : > { %v441_v37 = vadd.f32 %v440_v55, %v439_v35  ;;  %v448_v41 = vsel %vm434_vm4, %v432_v38, 0.0 }
  0x42   : > { %v443_v39 = vadd.f32 %v442_v56, %v441_v37 }
  0x44   : > { %v445_v40 = vadd.f32 %v444_v57, %v443_v39 }
  0x46   : > { %v447_v59 = vadd.f32 %v446_v60, %v445_v40 }
  0x48   : > { %v449_v42 = vadd.f32 %v448_v41, %v447_v59 }
  0x4a   : > { %v450_v43 = vrot.slane %v449_v42, 4 }
  0x4c   : > { %v451_v44 = vadd.f32 %v450_v43, %v449_v42 }
  0x4e   : > { %v452_v61 = vrot.slane %v451_v44, 2 }
  0x50   : > { %v453_v45 = vadd.f32 %v452_v61, %v451_v44 }
  0x52   : > { %v454_v46 = vrot.slane %v453_v45, 1 }
  0x54   : > { %v455_v48 = vadd.f32 %v454_v46, %v453_v45 }
  0x56   : > { %v456_v51 = vadd.f32 %v455_v48, %v433_v47 }
  0x58   : > { %458 = vst.msk [vmem:[#allocation2] sm:$0x1] %vm251_vm0, %v456_v51 }
  0x5f   : > { %v462_v52 = vld [vmem:[#allocation2] sm:$0x1] }
  0x60   : > { %463 = vst.msk [vmem:[%s222_s18] sm:$0x1] %vm251_vm0, %v462_v52 }
  0x61   : > { %680 = shalt.err (!%p677_p5)
}
  0x62   : > { %s681_s5 = scalar_lea.hbm %s475_s27, 16  ;;  %s685_s8 = scalar_lea.hbm %s975_s3, 32 }
  0x63   : > { %p682_p6 = scmp.ne.s32.totalorder %s475_s27, %s681_s5  ;;  %p686_p10 = scmp.lt.s32.totalorder %s475_s27, %s975_s3 }
  0x64   : > { %p687_p11 = scmp.lt.s32.totalorder %s685_s8, %s681_s5 }
  0x65   : > { %p683_p7 = pnand %p682_p6, %p807_p4 }
  0x66   : > { %p688_p12 = por %p687_p11, %p686_p10 }
  0x67   : > { %p684_p9 = pneg %p683_p7 }
  0x69   : > { %p689_p13 = pnand %p688_p12, %p684_p9 }
  0x6b   : > { %692 = shalt.err (!%p689_p13)
}
  0x6c   : > { %579 = dma.vmem_to_hbm [thread:$0]  (%p807_p4), %s928_s19, 16, %s475_s27, %s465_s28  }
  0x6d PF: > { %p585_p0 = scmp.ge.s32.totalorder %s743_s17, 2  ;;  %s489_s11 = sand.u32 1, %s723_s12  }
  0x6e   : > { %s490_s18 = scalar_lea.sflag [#allocation4], %s489_s11 }
  0x6f   : > { %p582_p1 = pnand %p585_p0, %p814_p8 }
  0x71   : > { %p583_p2 = pneg %p582_p1 }
  0x73   : > { %718 = dma.done.wait (%p583_p2), %s490_s18, 16  }
  0x74   : > { %720 = vsyncadd (%p583_p2), %s490_s18, 4294967280  ;;  %s16_s17 = sadd.s32 1, %s743_s17   ;;  %s978_s12 = smov %s727_s13 }
  0x75   : > { %p13_p3 = scmp.ge.s32.totalorder %s16_s17, 4   ;;  %s979_s13 = smov %s731_s14 }
  0x76   : > { %s980_s14 = smov %s820_s25  ;;  %s981_s15 = smov %s739_s16 }
  0x77   : > { %s982_s16 = smov %s984_s20  ;;  %15 = sbr.rel (!%p13_p3) target bundleno = 4 (0x4), region = 81 }
  0x7c   :  { %494 = vsyncpa [#allocation4], 1 }
  0x7d   :  { %496 = vsyncpa [#allocation4 + $0x1], 1 }

</bundles_post_ra>
